<compile_context>
chip_gen: v5e
topology: v5e:2x2
jax: 0.10.0
libtpu: 0.0.40
codegen_flags: <defaults>
</compile_context>

<pallas_src>
import math
from functools import partial

import jax
import jax.numpy as jnp
from jax import lax
from jax.experimental import pallas as pl
from jax.experimental.pallas import tpu as pltpu

# -- globals mirroring get_use_alibi() / get_params()['sliding_window_size'] --
USE_ALIBI = True
SLIDING_WINDOW_SIZE = 8

_VMEM_LIMIT_CACHE = None


def _vmem_limit_bytes():
    """Generation-dependent scoped-VMEM budget (~0.7 * capacity, capped)."""
    global _VMEM_LIMIT_CACHE
    if _VMEM_LIMIT_CACHE is None:
        limit = 32 * 1024 * 1024  # safe fallback on every generation
        try:
            info = pltpu.get_tpu_info()
            cap = getattr(info, "vmem_capacity_bytes", None)
            if cap:
                # v5e/v6e (128 MiB) -> ~90 MiB, v7x (64 MiB) -> ~45 MiB (DMA headroom)
                limit = max(32 * 1024 * 1024, min(int(cap * 0.7), 96 * 1024 * 1024))
        except Exception:
            pass
        _VMEM_LIMIT_CACHE = limit
    return _VMEM_LIMIT_CACHE


def _round_up(x, m):
    return ((x + m - 1) // m) * m


def _pick_tile(dim, prefs):
    """Largest preferred tile that divides dim, else the full dimension."""
    for p in prefs:
        if dim % p == 0:
            return p
    return dim


# ---------------------------------------------------------------------------
# Tiled projection matmul (bf16 MXU, f32 accumulation, fused output cast)
# ---------------------------------------------------------------------------
def _matmul_kernel_single(x_ref, w_ref, o_ref):
    a = x_ref[...]
    if a.dtype != w_ref.dtype:
        a = a.astype(w_ref.dtype)        # cast fused in-kernel (no XLA pass)
    o_ref[...] = jnp.dot(a, w_ref[...],
                         preferred_element_type=jnp.float32).astype(o_ref.dtype)


def _matmul_kernel_acc(x_ref, w_ref, o_ref, acc_ref):
    @pl.when(pl.program_id(2) == 0)
    def _init():
        acc_ref[...] = jnp.zeros_like(acc_ref)

    a = x_ref[...]
    if a.dtype != w_ref.dtype:
        a = a.astype(w_ref.dtype)
    acc_ref[...] += jnp.dot(a, w_ref[...], preferred_element_type=jnp.float32)

    @pl.when(pl.program_id(2) == pl.num_programs(2) - 1)
    def _store():
        o_ref[...] = acc_ref[...].astype(o_ref.dtype)


def pallas_matmul(x, w, out_dtype=None):
    """x: (M, K), w: (K, N) -> (M, N) in out_dtype. Tiled, pipelined, f32 accum."""
    M, K = x.shape
    Kw, N = w.shape
    assert K == Kw
    out_dtype = out_dtype if out_dtype is not None else x.dtype

    # M (= B*S) can be anything: pad it to a tile multiple instead of falling back
    # to a full-dimension (un-pipelined, VMEM-blowing) block.
    if M >= 512:
        tm = 512
    elif M >= 128:
        tm = 128
    else:
        tm = _round_up(M, 8)
    Mp = _round_up(M, tm)
    xp = jnp.pad(x, ((0, Mp - M), (0, 0))) if Mp != M else x

    # N, K are model dims (E / 3E); typically multiples of 128. Full-dim fallback
    # for small test configs is harmless (weights are small).
    tn = _pick_tile(N, (512, 256, 128))
    tk = _pick_tile(K, (512, 256, 128))

    if tk == K:
        # Single K step: no accumulator scratch, 2-D grid.
        out = pl.pallas_call(
            _matmul_kernel_single,
            out_shape=jax.ShapeDtypeStruct((Mp, N), out_dtype),
            grid=(Mp // tm, N // tn),
            in_specs=[
                pl.BlockSpec((tm, K), lambda i, j: (i, 0)),
                pl.BlockSpec((K, tn), lambda i, j: (0, j)),
            ],
            out_specs=pl.BlockSpec((tm, tn), lambda i, j: (i, j)),
            compiler_params=pltpu.CompilerParams(
                dimension_semantics=("parallel", "parallel"),
                vmem_limit_bytes=_vmem_limit_bytes()),
        )(xp, w)
    else:
        out = pl.pallas_call(
            _matmul_kernel_acc,
            out_shape=jax.ShapeDtypeStruct((Mp, N), out_dtype),
            grid=(Mp // tm, N // tn, K // tk),
            in_specs=[
                pl.BlockSpec((tm, tk), lambda i, j, k: (i, k)),
                pl.BlockSpec((tk, tn), lambda i, j, k: (k, j)),
            ],
            out_specs=pl.BlockSpec((tm, tn), lambda i, j, k: (i, j)),
            scratch_shapes=[pltpu.VMEM((tm, tn), jnp.float32)],
            compiler_params=pltpu.CompilerParams(
                dimension_semantics=("parallel", "parallel", "arbitrary"),
                vmem_limit_bytes=_vmem_limit_bytes()),
        )(xp, w)

    return out[:M] if Mp != M else out


# ---------------------------------------------------------------------------
# Flash attention: reads packed projection (B,S,3,H,D), writes (B,S,E) lane-dense
# ---------------------------------------------------------------------------
def _flash_attn_kernel(q_ref, k_ref, v_ref, o_ref, m_ref, l_ref, acc_ref, *,
                       num_heads, head_dim, seq_kv, window, q_tile, kv_tile,
                       use_alibi, start_token):
    qi = pl.program_id(1)
    kj = pl.program_id(2)

    @pl.when(kj == 0)
    def _init():
        m_ref[...] = jnp.full_like(m_ref, -1e30)
        l_ref[...] = jnp.zeros_like(l_ref)
        acc_ref[...] = jnp.zeros_like(acc_ref)

    # Global positions of this (q-tile, kv-step). The kv tile index is clamped in
    # the BlockSpec index_map; out-of-range steps are fully masked here, so
    # clamped duplicate tiles contribute exactly zero.
    q_start = qi * q_tile
    first_kv_tile = jnp.maximum(q_start - (window - 1), 0) // kv_tile
    kv_start = (first_kv_tile + kj) * kv_tile

    q_pos = q_start + lax.broadcasted_iota(jnp.int32, (q_tile, kv_tile), 0)
    kv_pos = kv_start + lax.broadcasted_iota(jnp.int32, (q_tile, kv_tile), 1)
    dist = q_pos - kv_pos
    mask = (dist >= 0) & (dist < window) & (kv_pos < seq_kv)
    if use_alibi:
        bias_base = (dist + start_token).astype(jnp.float32)   # (Tq, Tk)

    sm_scale = 1.0 / math.sqrt(head_dim)
    neg_big = jnp.float32(-1e30)

    # q_ref/k_ref/v_ref have layout (T, H, D) straight from the packed projection.
    # Per-head 2-D dots: static slices + standard MXU matmuls, no 3-D transposes.
    for h in range(num_heads):
        qh = q_ref[:, h, :]                                    # (Tq, D)
        kh = k_ref[:, h, :]                                    # (Tk, D)
        vh = v_ref[:, h, :]                                    # (Tk, D)

        s = lax.dot_general(qh, kh, (((1,), (1,)), ((), ())),
                            preferred_element_type=jnp.float32) * sm_scale
        if use_alibi:
            # ALiBi slope is a compile-time constant per head (hoisted).
            s = s + bias_base * (2.0 ** (-(h + 1) * 8.0 / num_heads))
        s = jnp.where(mask, s, neg_big)

        # Online softmax (f32 state).
        m_prev = m_ref[h]                                      # (Tq, 1)
        m_new = jnp.maximum(m_prev, jnp.max(s, axis=-1, keepdims=True))
        alpha = jnp.exp(m_prev - m_new)
        p = jnp.where(mask, jnp.exp(s - m_new), 0.0)           # robust for fully-masked tiles
        l_ref[h] = alpha * l_ref[h] + jnp.sum(p, axis=-1, keepdims=True)
        acc_ref[h] = alpha * acc_ref[h] + jnp.dot(
            p.astype(vh.dtype), vh, preferred_element_type=jnp.float32)
        m_ref[h] = m_new

    @pl.when(kj == pl.num_programs(2) - 1)
    def _finalize():
        # Lane-dense (Tq, E) output block: per-head static lane slices in VMEM,
        # one dense E-wide HBM writeback per (b, q-tile).
        for h in range(num_heads):
            l = l_ref[h]
            inv = pl.reciprocal(l, approx=True)                # EUP slot
            inv = inv * (2.0 - l * inv)                        # one Newton step
            o_ref[:, h * head_dim:(h + 1) * head_dim] = (
                acc_ref[h] * inv).astype(o_ref.dtype)


def pallas_flash_attention(proj, *, sliding_window_size, use_alibi, start_token,
                           q_tile=None, kv_tile=None):
    """proj: (B, S, 3, H, D) packed q/k/v projection -> attention output (B, S, E)."""
    B, S, three, H, D = proj.shape
    assert three == 3
    E = H * D
    Skv = S
    window = sliding_window_size if sliding_window_size is not None else Skv

    Tq = q_tile if q_tile is not None else _pick_tile(S, (128, 64, 32, 16, 8))
    Tk = kv_tile if kv_tile is not None else _pick_tile(Skv, (128, 64, 32, 16, 8))
    assert S % Tq == 0 and Skv % Tk == 0
    n_q = S // Tq
    n_kv_tiles = Skv // Tk

    # Static max number of KV tiles inside the causal+window band of any q tile.
    n_kv_steps = 1
    for qi in range(n_q):
        first = max(qi * Tq - (window - 1), 0) // Tk
        last = min(qi * Tq + Tq - 1, Skv - 1) // Tk
        n_kv_steps = max(n_kv_steps, last - first + 1)

    def q_map(b, qi, kj):
        return (b, qi, 0, 0, 0)

    def k_map(b, qi, kj):
        first = jnp.maximum(qi * Tq - (window - 1), 0) // Tk
        return (b, jnp.minimum(first + kj, n_kv_tiles - 1), 1, 0, 0)

    def v_map(b, qi, kj):
        first = jnp.maximum(qi * Tq - (window - 1), 0) // Tk
        return (b, jnp.minimum(first + kj, n_kv_tiles - 1), 2, 0, 0)

    def o_map(b, qi, kj):
        return (b, qi, 0)

    kernel = partial(
        _flash_attn_kernel,
        num_heads=H, head_dim=D, seq_kv=Skv, window=window,
        q_tile=Tq, kv_tile=Tk, use_alibi=use_alibi, start_token=start_token,
    )

    return pl.pallas_call(
        kernel,
        out_shape=jax.ShapeDtypeStruct((B, S, E), proj.dtype),
        grid=(B, n_q, n_kv_steps),
        in_specs=[
            pl.BlockSpec((None, Tq, None, H, D), q_map),
            pl.BlockSpec((None, Tk, None, H, D), k_map),
            pl.BlockSpec((None, Tk, None, H, D), v_map),
        ],
        out_specs=pl.BlockSpec((None, Tq, E), o_map),
        scratch_shapes=[
            pltpu.VMEM((H, Tq, 1), jnp.float32),   # m (running max)
            pltpu.VMEM((H, Tq, 1), jnp.float32),   # l (running denom)
            pltpu.VMEM((H, Tq, D), jnp.float32),   # acc
        ],
        compiler_params=pltpu.CompilerParams(
            dimension_semantics=("parallel", "parallel", "arbitrary"),
            vmem_limit_bytes=_vmem_limit_bytes()),
    )(proj, proj, proj)


# ---------------------------------------------------------------------------
# Module wrapper (parameter setup + free reshapes in plain JAX, hot path in Pallas)
# ---------------------------------------------------------------------------
class CachedMultiheadAttentionPallas:
    def __init__(self, embed_dim, num_heads, sliding_window_size, start_token=0,
                 *, rng, compute_dtype=jnp.bfloat16, q_tile=None, kv_tile=None):
        assert embed_dim % num_heads == 0
        self.embed_dim = embed_dim
        self.num_heads = num_heads
        self.head_dim = embed_dim // num_heads
        self.sliding_window_size = sliding_window_size
        self.start_token = start_token
        self.compute_dtype = compute_dtype      # bf16: native MXU rate on v5e/v6e/v7x
        self.q_tile = q_tile
        self.kv_tile = kv_tile
        k1, k2 = jax.random.split(rng)
        bound = 1.0 / math.sqrt(embed_dim)
        # Weights pre-transposed to (K, N) layout (torch Linear weight.T), bf16:
        #   in_proj: (E, 3E),  out_proj: (E, E)  -> no runtime .T, no runtime cast
        self.w_in_t = jax.random.uniform(k1, (embed_dim, 3 * embed_dim),
                                         jnp.float32, -bound, bound).astype(compute_dtype)
        self.w_out_t = jax.random.uniform(k2, (embed_dim, embed_dim),
                                          jnp.float32, -bound, bound).astype(compute_dtype)

    def __call__(self, query, key=None, value=None):
        # Self-attention: key/value must be the same tensor as query (or None).
        if key is not None and key is not query:
            raise Exception('Self attention must have same query, key and value')
        if value is not None and value is not query:
            raise Exception('Self attention must have same query, key and value')

        B, S, E = query.shape
        H, D = self.num_heads, self.head_dim

        # QKV projection on (B*S, E); activation->bf16 cast and the bf16 output
        # cast both happen inside the kernel (no extra XLA passes).
        proj = pallas_matmul(query.reshape(B * S, E), self.w_in_t,
                             out_dtype=self.compute_dtype)       # (B*S, 3E)
        proj = proj.reshape(B, S, 3, H, D)                       # free reshape

        # Flash attention reads q/k/v straight out of the packed layout and writes
        # a lane-dense (B, S, E) output — no XLA transposes anywhere.
        attn = pallas_flash_attention(
            proj,
            sliding_window_size=self.sliding_window_size,
            use_alibi=USE_ALIBI, start_token=self.start_token,
            q_tile=self.q_tile, kv_tile=self.kv_tile)            # (B, S, E) bf16

        # Output projection; final cast back to the query dtype fused in-kernel.
        out = pallas_matmul(attn.reshape(B * S, E), self.w_out_t,
                            out_dtype=query.dtype).reshape(B, S, E)

        # TODO(synk): kv-cache (use_cache=True / torch.roll cache update),
        # cross-attention branch and padding sequence_lengths score-mods are not
        # implemented; this covers the use_cache=False self-attention path.
        return out, None


# ---------------------------------------------------------------------------
# Pure-JAX reference (mirrors the kernel's bf16/f32 numerics) for verification
# ---------------------------------------------------------------------------
def reference_forward(query, w_in_t, w_out_t, num_heads, sliding_window_size,
                      use_alibi, start_token, compute_dtype):
    B, S, E = query.shape
    H, D = num_heads, E // num_heads
    xq = query.reshape(B * S, E).astype(compute_dtype)
    proj = jnp.dot(xq, w_in_t, preferred_element_type=jnp.float32).astype(compute_dtype)
    proj = proj.reshape(B, S, 3, H, D)
    q = jnp.transpose(proj[:, :, 0], (0, 2, 1, 3))
    k = jnp.transpose(proj[:, :, 1], (0, 2, 1, 3))
    v = jnp.transpose(proj[:, :, 2], (0, 2, 1, 3))
    s = jnp.einsum('bhqd,bhkd->bhqk', q, k,
                   preferred_element_type=jnp.float32) / math.sqrt(D)
    q_idx = jnp.arange(S)[:, None]
    kv_idx = jnp.arange(S)[None, :]
    if use_alibi:
        h = jnp.arange(H, dtype=jnp.float32)
        scale = jnp.exp2(-(h + 1.0) * (8.0 / H))
        bias = (q_idx + start_token - kv_idx).astype(jnp.float32)
        s = s + bias[None, None] * scale[None, :, None, None]
    mask = q_idx >= kv_idx
    if sliding_window_size is not None:
        mask = mask & ((q_idx - kv_idx) < sliding_window_size)
    s = jnp.where(mask[None, None], s, -jnp.inf)
    p = jax.nn.softmax(s, axis=-1)
    attn = jnp.einsum('bhqk,bhkd->bhqd', p.astype(compute_dtype), v,
                      preferred_element_type=jnp.float32)
    attn2d = jnp.transpose(attn, (0, 2, 1, 3)).reshape(B * S, E).astype(compute_dtype)
    out = jnp.dot(attn2d, w_out_t, preferred_element_type=jnp.float32).astype(query.dtype)
    return out.reshape(B, S, E)


if __name__ == "__main__":
    batch, seq, embed, heads = 2, 16, 32, 4

    root = jax.random.PRNGKey(0)
    k_param, k_x, k_x2 = jax.random.split(root, 3)

    # ---- config 1: single KV step (tiles cover the whole sequence) ----
    mha = CachedMultiheadAttentionPallas(
        embed_dim=embed, num_heads=heads,
        sliding_window_size=SLIDING_WINDOW_SIZE, start_token=0, rng=k_param)
    query = jax.random.normal(k_x, (batch, seq, embed), dtype=jnp.float32)
    out, kv_cache = mha(query, query, query)
    out = jax.block_until_ready(out)
    ref = reference_forward(query, mha.w_in_t, mha.w_out_t, heads,
                            SLIDING_WINDOW_SIZE, USE_ALIBI, 0, mha.compute_dtype)
    assert out.shape == (batch, seq, embed)
    err = float(jnp.max(jnp.abs(out - ref)))
    assert jnp.allclose(out, ref, rtol=2e-2, atol=2e-2), \
        f"Pallas output mismatch vs JAX reference (config 1), max abs err {err}"

    # ---- config 2: small tiles -> exercises the multi-step online-softmax loop
    #      and the sliding-window KV-tile-skipping index_map ----
    seq2 = 32
    mha2 = CachedMultiheadAttentionPallas(
        embed_dim=embed, num_heads=heads,
        sliding_window_size=SLIDING_WINDOW_SIZE, start_token=0, rng=k_param,
        q_tile=8, kv_tile=8)
    query2 = jax.random.normal(k_x2, (batch, seq2, embed), dtype=jnp.float32)
    out2, _ = mha2(query2, query2, query2)
    out2 = jax.block_until_ready(out2)
    ref2 = reference_forward(query2, mha2.w_in_t, mha2.w_out_t, heads,
                             SLIDING_WINDOW_SIZE, USE_ALIBI, 0, mha2.compute_dtype)
    err2 = float(jnp.max(jnp.abs(out2 - ref2)))
    assert jnp.allclose(out2, ref2, rtol=2e-2, atol=2e-2), \
        f"Pallas output mismatch vs JAX reference (config 2, tiled KV), max abs err {err2}"

    print("KERNEL_OK")
</pallas_src>

<mosaic_0001>
module attributes {stable_mosaic.version = 11 : i64} {
  func.func @_matmul_kernel_single(%arg0: i32, %arg1: i32, %arg2: memref<32x32xf32, #tpu.memory_space<vmem>>, %arg3: memref<32x96xbf16, #tpu.memory_space<vmem>>, %arg4: memref<32x96xbf16, #tpu.memory_space<vmem>>) attributes {dimension_semantics = [#tpu.dimension_semantics<parallel>, #tpu.dimension_semantics<parallel>], iteration_bounds = array<i64: 1, 1>, scalar_prefetch = 0 : i64, scratch_operands = 0 : i64, tpu.core_type = #tpu.core_type<tc>, window_params = [{transform_indices = @transform_0, window_bounds = array<i64: 32, 32>}, {transform_indices = @transform_1, window_bounds = array<i64: 32, 96>}, {transform_indices = @transform_2, window_bounds = array<i64: 32, 96>}]} {
    %c0 = arith.constant 0 : index
    %c0_0 = arith.constant 0 : index
    %0 = vector.load %arg2[%c0, %c0_0] : memref<32x32xf32, #tpu.memory_space<vmem>>, vector<32x32xf32>
    %1 = arith.truncf %0 : vector<32x32xf32> to vector<32x32xbf16>
    %c0_1 = arith.constant 0 : index
    %c0_2 = arith.constant 0 : index
    %2 = vector.load %arg3[%c0_1, %c0_2] : memref<32x96xbf16, #tpu.memory_space<vmem>>, vector<32x96xbf16>
    %cst = arith.constant dense<0.000000e+00> : vector<32x96xf32>
    %3 = tpu.matmul %1, %2, %cst {dimension_numbers = #tpu.dot_dimension_numbers<[1], [0], [0], [1], [0, 0, 1, 1], [], []>} : vector<32x32xbf16>, vector<32x96xbf16>, vector<32x96xf32> -> vector<32x96xf32>
    %4 = arith.truncf %3 : vector<32x96xf32> to vector<32x96xbf16>
    %c0_3 = arith.constant 0 : index
    %c0_4 = arith.constant 0 : index
    %5 = vector.load %arg4[%c0_3, %c0_4] : memref<32x96xbf16, #tpu.memory_space<vmem>>, vector<32x96xbf16>
    tpu.vector_store %arg4[%c0_3, %c0_4], %4 {strides = array<i32>} : memref<32x96xbf16, #tpu.memory_space<vmem>>, vector<32x96xbf16>,
    return
  }
  func.func @transform_0(%arg0: i32, %arg1: i32) -> (i32, i32) {
    %c0_i32 = arith.constant 0 : i32
    %c0_i32_0 = arith.constant 0 : i32
    return %arg0, %c0_i32 : i32, i32
  }
  func.func @transform_1(%arg0: i32, %arg1: i32) -> (i32, i32) {
    %c0_i32 = arith.constant 0 : i32
    %c0_i32_0 = arith.constant 0 : i32
    return %c0_i32, %arg1 : i32, i32
  }
  func.func @transform_2(%arg0: i32, %arg1: i32) -> (i32, i32) {
    %c0_i32 = arith.constant 0 : i32
    return %arg0, %arg1 : i32, i32
  }
}

</mosaic_0001>

<bundles_post_ra>
// kernel: tpu_custom_call.1
= control target key start
LH: loop header
LB: loop body
LE: loop exit
PB: predicated region body
PF: predicated region fallthrough
CT: control target
= control target key end

     0   :  { %7 = vsyncpa [#allocation3], 0  ;;  %s262_s0 = inlined_call_operand.hbm [shape: f32[32,32], index: 0, kind: input, shape index: {}]   ;;  %s263_s1 = inlined_call_operand.hbm [shape: bf16[32,96], index: 1, kind: input, shape index: {}]   ;;  %s264_s2 = inlined_call_operand.hbm [shape: bf16[32,96], index: 2, kind: output, shape index: {}]  }
   0x1   :  { %8 = vsyncpa [#allocation6], 0 }
   0x2   :  { %9 = vsyncpa [#allocation4], 0  ;;  %s14_s11 = sshll.u32 %s262_s0, 4  ;;  %s221_s12 = smov [#allocation2]   ;;  %s15_s11 = int_to_ptr.hbm [resolvable:$true] %s14_s11 }
   0x3   :  { %s16_s13 = sshll.u32 %s221_s12, 4  ;;  %s27_s16 = sshll.u32 %s263_s1, 4  ;;  %s17_s13 = int_to_ptr.vmem [resolvable:$true] %s16_s13  ;;  %s28_s16 = int_to_ptr.hbm [resolvable:$true] %s27_s16 }
   0x4   :  { %s222_s17 = smov 128   ;;  %s223_s18 = smov 8  }
   0x5   :  { %22 = dma.hbm_to_vmem [thread:$0]  %s15_s11, 512, %s17_s13, [#allocation3], %s222_s17, %s222_s17, %s223_s18  }
   0x6   :  { %s224_s19 = smov [#allocation5]   ;;  %s225_s21 = smov 64  }
   0x7   :  { %s29_s20 = sshll.u32 %s224_s19, 4  ;;  %s226_s22 = smov 4   ;;  %s30_s20 = int_to_ptr.vmem [resolvable:$true] %s29_s20 }
   0x8   :  { %35 = dma.hbm_to_vmem [thread:$0]  %s28_s16, 256, %s30_s20, [#allocation6], %s225_s21, %s225_s21, %s226_s22  }
   0x9   :  { %215 = dma.done.wait [#allocation3], 512  }
   0xa   :  { %216 = vsyncadd [#allocation3], 4294966784 }
   0xb   :  { %217 = dma.done.wait [#allocation6], 256  }
   0xc   :  { %218 = vsyncadd [#allocation6], 4294967040  ;;  %v133_v0 = vld [vmem:[#allocation5 + $0x8] sm:$0xff]  ;;  %v132_v1 = vld [vmem:[#allocation5] sm:$0xff]  ;;  %vm67_vm0 = vcmask 261120   ;;  %vm97_vm1 = vcmask 781312  }
   0xd   :  { %v45_v2 = vld [vmem:[#allocation2] sm:$0xff]  ;;  %80 = vmatpush.bf16.msra.mxu0 %v133_v0  ;;  %134 = vmatpush.bf16.msra.mxu1 %v133_v0  ;;  %v46_v3 = vld [vmem:[#allocation2 + $0x8] sm:$0xff]  ;;  %v47_v4 = vld [vmem:[#allocation2 + $0x10] sm:$0xff]  ;;  %s227_s0 = smov [#allocation7]   ;;  %s108_s25 = sshll.u32 %s264_s2, 4  ;;  %s109_s25 = int_to_ptr.hbm [resolvable:$true] %s108_s25 }
   0xe   :  { %v48_v5 = vld [vmem:[#allocation2 + $0x18] sm:$0xff]  ;;  %v49_v6 = vpack.c.bf16 %v46_v3, %v45_v2  ;;  %s106_s1 = sshll.u32 %s227_s0, 4  ;;  %s107_s1 = int_to_ptr.vmem [resolvable:$true] %s106_s1 }
   0xf   :  { %v50_v7 = vpack.c.bf16 %v48_v5, %v47_v4 }
  0x11   :  { %81 = vmatpush.bf16.msra.mxu0 %v132_v1  ;;  %135 = vmatpush.bf16.msra.mxu1 %v132_v1 }
  0x14   :  { %130 = vmatmul.msk.bf16.vlgmr.msra.gmra.mxu0 %vm67_vm0, %v49_v6  ;;  %131 = vmatmul.msk.bf16.vlgmr.msra.gmra.mxu1 %vm67_vm0, %v50_v7 }
  0x91   :  { %v83_v8 = vpop.f32.mrf.mxu0  ;;  %v88_v9 = vpop.f32.mrf.mxu1 }
  0x92   :  { %v93_v10 = vpack.c.bf16 %v83_v8, %v83_v8  ;;  %v95_v11 = vpack.c.bf16 %v88_v9, %v88_v9 }
  0x94   :  { %98 = vst.msk [vmem:[#allocation7] sm:$0xf] %vm97_vm1, %v93_v10 }
  0x95   :  { %100 = vst.msk [vmem:[#allocation7 + $0x8] sm:$0xf] %vm97_vm1, %v95_v11 }
  0x99   :  { %v85_v12 = vpop.f32.mrf.mxu0  ;;  %v90_v13 = vpop.f32.mrf.mxu1 }
  0x9a   :  { %v94_v14 = vpack.c.bf16 %v85_v12, %v85_v12  ;;  %v96_v15 = vpack.c.bf16 %v90_v13, %v90_v13 }
  0x9c   :  { %99 = vst.msk [vmem:[#allocation7 + $0x4] sm:$0xf] %vm97_vm1, %v94_v14 }
  0x9d   :  { %101 = vst.msk [vmem:[#allocation7 + $0xc] sm:$0xf] %vm97_vm1, %v96_v15 }
  0x9e   :  { %114 = dma.vmem_to_hbm [thread:$0]  %s107_s1, 256, %s109_s25, [#allocation4], %s225_s21, %s225_s21, %s226_s22  }
  0x9f   :  { %219 = dma.done.wait [#allocation4], 256  }
  0xa0   :  { %220 = vsyncadd [#allocation4], 4294967040 }
  0xa1   :  { %119 = vsyncpa [#allocation3], 1 }
  0xa2   :  { %120 = vsyncpa [#allocation6], 1 }
  0xa3   :  { %121 = vsyncpa [#allocation4], 1 }

</bundles_post_ra>
